<compile_context>
chip_gen: v5e
topology: v5e:2x2
jax: 0.10.0
libtpu: 0.0.40
codegen_flags: <defaults>
</compile_context>

<pallas_src>
from functools import partial

import numpy as np
import jax
import jax.numpy as jnp
from jax.experimental import pallas as pl
from jax.experimental.pallas import tpu as pltpu

TEMPERATURE = 0.01


# -----------------------------------------------------------------------------
# Parameter preprocessing: two-level residual quantization of U (host-side).
# -----------------------------------------------------------------------------
def _sigmoid(x):
    return 1.0 / (1.0 + np.exp(-x))


def _df_lt(a, b, temp):
    return _sigmoid((a - b) / temp)


def compute_quantized_weight(U, thres_mean, in_channels, out_channels, ksize,
                             N, maxBWPow=2, num_possible_partitions=5):
    """Mirrors the forward-pass weight construction of the PyTorch module."""
    U = np.asarray(U, dtype=np.float32)
    thres_mean = np.asarray(thres_mean, dtype=np.float32)
    res_denos = np.array([2 ** 2 - 1, 2 ** 2 + 1, 2 ** 4 + 1, 2 ** 8 + 1, 2 ** 16 + 1],
                         dtype=np.float32)
    D = U.shape[1]
    beta, alpha = U.max(), U.min()

    s = None
    vals = None
    for idx in range(maxBWPow):
        deno = res_denos[idx]
        if s is None:
            s = (beta - alpha) / deno
            vals = (s * np.floor(U / s))[None]                      # (1, N, D)
        else:
            s = s / deno
            res_err = U - vals.sum(0)                               # (N, D)

            # sort residual errors per column (over the ensemble axis)
            idx_maps = np.argsort(res_err, axis=0, kind="stable")   # (N, D)
            sorted_err = np.take_along_axis(res_err, idx_maps, axis=0)
            transfer_matrix = np.eye(N, dtype=np.float32)[idx_maps]  # (N, D, N) one-hot

            delta = sorted_err[1:] - sorted_err[:-1]                 # (N-1, D)
            dmax = delta.max()
            # Guard against all-equal residuals (reference would produce NaN here).
            delta = delta / dmax if dmax != 0.0 else delta
            thres = _sigmoid(np.repeat(thres_mean, in_channels * ksize * ksize))  # (D,)
            mean_split_point = _df_lt(delta, thres, 0.01)            # (N-1, D)
            round_split = np.round(mean_split_point)

            # cluster columns by their (rounded) split scheme
            values, indices, counts = np.unique(round_split, axis=1,
                                                return_inverse=True, return_counts=True)
            indices = np.asarray(indices).reshape(-1)
            s_indices = np.argsort(-counts, kind="stable")
            top = s_indices[:num_possible_partitions]

            clustered_indices = indices.copy()
            for s_idx_less in s_indices[num_possible_partitions:]:
                inter = values[:, s_idx_less][:, None] * values[:, top]  # (N-1, P)
                selected_center = int(np.argmax(inter.sum(axis=0)))
                clustered_indices[clustered_indices == s_idx_less] = top[selected_center]

            pieces = []
            inner_idxs = []
            for s_idx in top:
                mask = clustered_indices == s_idx
                inner_idxs.append(np.nonzero(mask)[0])
                piece = sorted_err[:, mask]                         # (N, m)
                split_scheme = round_split[:, s_idx]                # (N-1,)
                buf = 0.0
                local_cnt = 0
                grad_ = 1.0
                t_l = []
                for iidx in range(N):
                    buf = buf + piece[iidx]
                    local_cnt += 1
                    if iidx == N - 1:
                        t_l.append(np.broadcast_to(grad_ * (buf / local_cnt),
                                                   (local_cnt, piece.shape[1])))
                    elif np.round(split_scheme[iidx]) != 0.0:
                        grad_ = grad_ * mean_split_point[iidx, s_idx]
                        t_l.append(np.broadcast_to(grad_ * (buf / local_cnt),
                                                   (local_cnt, piece.shape[1])))
                        buf = 0.0
                        local_cnt = 0
                        grad_ = 1.0
                    else:
                        grad_ = grad_ * (1.0 - mean_split_point[iidx, s_idx])
                pieces.append(np.concatenate(t_l, axis=0))          # (N, m)

            inner_idxs = np.concatenate(inner_idxs)                  # (D,) permutation
            # TODO(synk): the reference builds this map via index_put on a (1, D)
            # tensor, which is ill-formed as written; implemented as the intended
            # inverse permutation restoring original column order.
            inv = np.zeros(D, dtype=np.int64)
            inv[inner_idxs] = np.arange(D)
            cat_pieces = np.concatenate(pieces, axis=1)              # (N, D) grouped order
            inner_grouped = cat_pieces[:, inv]                       # (N, D) original cols
            # un-sort the rows back to the original ensemble-member order
            grouped = np.einsum("cb,cba->ab", inner_grouped, transfer_matrix)
            quantized = s * np.floor(grouped / s)
            vals = np.concatenate([vals, quantized[None]], axis=0)

    w = vals.sum(0).reshape(out_channels * N, in_channels, ksize, ksize)
    return w.astype(np.float32)


def build_block_diag_weight(w, N, Cout, Cin, k):
    """(N*Cout, Cin, k, k) OIHW grouped weights -> (N*Cout, N*K) block-diagonal."""
    K = Cin * k * k
    w_g = np.asarray(w, dtype=np.float32).reshape(N, Cout, K)        # (N, Cout, K)
    w_bd = np.zeros((N * Cout, N * K), dtype=np.float32)
    for g in range(N):
        w_bd[g * Cout:(g + 1) * Cout, g * K:(g + 1) * K] = w_g[g]
    return w_bd


# -----------------------------------------------------------------------------
# Pallas kernel: grouped conv as one block-diagonal lane-dense matmul on the MXU.
# -----------------------------------------------------------------------------
def _blockdiag_matmul_kernel(w_ref, p_ref, o_ref):
    # w_ref: (N*Cout, N*K)   block-diagonal weights (same block every grid step)
    # p_ref: (1, N*K, TM)    im2col patches, N*K on sublanes, spatial on lanes
    # o_ref: (1, N*Cout, TM) lane-dense, unmasked 20-row output slab
    o_ref[0] = jnp.dot(w_ref[...], p_ref[0],
                       preferred_element_type=jnp.float32).astype(o_ref.dtype)


def _pick_tile_m(M, NK, NCout, max_tile_m, vmem_budget_bytes):
    """Largest multiple-of-128 divisor of M that fits the VMEM budget."""
    if M <= 128 or M % 128 != 0:
        # TODO(synk): for large non-128-divisible spatial extents, pad M to a
        # multiple of 128 and mask the last tile instead of one unpipelined block.
        return M
    bytes_per_lane = 2 * (NK + NCout) * 4            # double-buffered in + out blocks
    budget = vmem_budget_bytes - 2 * NCout * NK * 4  # minus (double-buffered) weights
    cap = min(max_tile_m, max(128, budget // bytes_per_lane))
    best = 128
    for t in range(128, M + 1, 128):
        if M % t == 0 and t <= cap:
            best = t
    return best


def grouped_conv_pallas(patches, w_bd, *, max_tile_m=2048,
                        vmem_budget_bytes=48 * 1024 * 1024):
    """patches: (B_eff, N*K, M) f32, w_bd: (N*Cout, N*K) f32 -> (B_eff, N*Cout, M)."""
    B_eff, NK, M = patches.shape
    NCout = w_bd.shape[0]
    tile_m = _pick_tile_m(M, NK, NCout, max_tile_m, vmem_budget_bytes)
    grid = (B_eff, M // tile_m)

    # Explicit VMEM limit: sized for the chosen tile, safe on v7x (64 MiB physical,
    # 32 MiB scoped default) as well as v5e's 16 MiB scoped default.
    vmem_need = 2 * (NK + NCout) * tile_m * 4 + 2 * NCout * NK * 4
    vmem_limit = int(min(max(2 * vmem_need, 8 * 1024 * 1024), 64 * 1024 * 1024))

    return pl.pallas_call(
        _blockdiag_matmul_kernel,
        out_shape=jax.ShapeDtypeStruct((B_eff, NCout, M), jnp.float32),
        grid=grid,
        in_specs=[
            pl.BlockSpec((NCout, NK), lambda b, m: (0, 0)),        # constant block
            pl.BlockSpec((1, NK, tile_m), lambda b, m: (b, 0, m)),
        ],
        out_specs=pl.BlockSpec((1, NCout, tile_m), lambda b, m: (b, 0, m)),
        compiler_params=pltpu.CompilerParams(
            dimension_semantics=("parallel", "parallel"),
            vmem_limit_bytes=vmem_limit),
    )(w_bd, patches)


def _im2col_grouped_nchw(x, N, Cin, k, stride, padding, dilation):
    """x: (B, Cin, H, W) NCHW with B % N == 0.

    Returns patches (B/N, N*Cin*k*k, Ho*Wo) — N*K on sublanes, lane-dense spatial —
    plus (Ho, Wo).  Index n*K + c*(k*k) + kh*k + kw matches the block-diagonal
    OIHW weight flatten.
    """
    B, _, H, W = x.shape
    B_eff = B // N
    xg = x.reshape(B_eff, N * Cin, H, W)                            # grouped channels
    xp = jnp.pad(xg, ((0, 0), (0, 0), (padding, padding), (padding, padding)))
    Ho = (H + 2 * padding - dilation * (k - 1) - 1) // stride + 1
    Wo = (W + 2 * padding - dilation * (k - 1) - 1) // stride + 1
    cols = []
    for kh in range(k):
        for kw in range(k):
            sl = xp[:, :,
                    kh * dilation: kh * dilation + (Ho - 1) * stride + 1: stride,
                    kw * dilation: kw * dilation + (Wo - 1) * stride + 1: stride]
            cols.append(sl)                                          # (B/N, N*Cin, Ho, Wo)
    pat = jnp.stack(cols, axis=2)                                    # (B/N, N*Cin, k*k, Ho, Wo)
    pat = pat.reshape(B_eff, N * Cin * k * k, Ho * Wo)               # (B/N, N*K, Ho*Wo)
    return pat, Ho, Wo


@partial(jax.jit, static_argnums=(2, 3, 4, 5, 6, 7, 8))
def forward(x, w_bd, N, Cin, Cout, k, stride, padding, dilation):
    """Forward pass of the module (first=False): x NCHW (B, Cin, H, W), B % N == 0."""
    # TODO(synk): at large Cin / spatial extents, fuse the im2col into the kernel
    # (manual DMA of shifted x tiles, memory_space=pl.ANY) to cut the k^2 patch
    # inflation of HBM reads; at these sizes the jit-fused XLA im2col is cheaper.
    B = x.shape[0]
    patches, Ho, Wo = _im2col_grouped_nchw(x, N, Cin, k, stride, padding, dilation)
    out = grouped_conv_pallas(patches, w_bd)                         # (B/N, N*Cout, Ho*Wo)
    # (B/N, N*Cout, Ho*Wo) row-flattens directly to the PyTorch act.view(B, Cout, ...)
    return out.reshape(B, Cout, Ho, Wo)


if __name__ == "__main__":
    # module config
    N = 5
    in_channels, out_channels, kernel_size = 4, 4, 3
    stride, padding, dilation = 1, 1, 1
    bw = 2
    B, H, W = 2 * N, 16, 16
    D = in_channels * out_channels * kernel_size * kernel_size

    key = jax.random.PRNGKey(0)
    kU, kx = jax.random.split(key)

    # deterministic parameter init (kaiming_normal on (N, D): std = sqrt(2 / D))
    U = jax.random.normal(kU, (N, D), dtype=jnp.float32) * np.sqrt(2.0 / D)
    thres_mean = np.full((out_channels,), -1.3, dtype=np.float32)
    thres_var = np.array([-2.197], dtype=np.float32)  # present in module, unused in forward

    x = jax.random.normal(kx, (B, in_channels, H, W), dtype=jnp.float32)

    # forward-pass weight construction (parameter-only preprocessing, host-side)
    w_np = compute_quantized_weight(np.asarray(U), thres_mean, in_channels,
                                    out_channels, kernel_size, N, maxBWPow=bw)
    w = jnp.asarray(w_np)                                            # (N*Cout, Cin, k, k)
    w_bd = jnp.asarray(build_block_diag_weight(w_np, N, out_channels,
                                               in_channels, kernel_size))

    out = forward(x, w_bd, N, in_channels, out_channels, kernel_size,
                  stride, padding, dilation)
    out = jax.block_until_ready(out)

    # reference check against XLA's grouped conv
    x_g = x.reshape(B // N, N * in_channels, H, W)
    ref = jax.lax.conv_general_dilated(
        x_g, w, window_strides=(stride, stride),
        padding=((padding, padding), (padding, padding)),
        rhs_dilation=(dilation, dilation),
        dimension_numbers=("NCHW", "OIHW", "NCHW"),
        feature_group_count=N)
    ref = ref.reshape(B, out_channels, ref.shape[-2], ref.shape[-1])
    assert out.shape == ref.shape, (out.shape, ref.shape)
    assert not bool(jnp.any(jnp.isnan(out)))
    np.testing.assert_allclose(np.asarray(out), np.asarray(ref), rtol=1e-4, atol=1e-4)

    print("KERNEL_OK")
</pallas_src>

<mosaic_0001>
module attributes {stable_mosaic.version = 11 : i64} {
  func.func @_blockdiag_matmul_kernel(%arg0: i32, %arg1: i32, %arg2: memref<20x180xf32, #tpu.memory_space<vmem>>, %arg3: memref<1x180x256xf32, #tpu.memory_space<vmem>>, %arg4: memref<1x20x256xf32, #tpu.memory_space<vmem>>) attributes {dimension_semantics = [#tpu.dimension_semantics<parallel>, #tpu.dimension_semantics<parallel>], iteration_bounds = array<i64: 2, 1>, scalar_prefetch = 0 : i64, scratch_operands = 0 : i64, tpu.core_type = #tpu.core_type<tc>, window_params = [{pipeline_mode = #tpu.pipeline_mode<synchronous>, transform_indices = @transform_0, window_bounds = array<i64: 20, 180>}, {transform_indices = @transform_1, window_bounds = array<i64: 1, 180, 256>}, {transform_indices = @transform_2, window_bounds = array<i64: 1, 20, 256>}]} {
    %c0 = arith.constant 0 : index
    %c0_0 = arith.constant 0 : index
    %0 = vector.load %arg2[%c0, %c0_0] : memref<20x180xf32, #tpu.memory_space<vmem>>, vector<20x180xf32>
    %c0_1 = arith.constant 0 : index
    %c0_2 = arith.constant 0 : index
    %c0_3 = arith.constant 0 : index
    %1 = vector.load %arg3[%c0_1, %c0_2, %c0_3] : memref<1x180x256xf32, #tpu.memory_space<vmem>>, vector<1x180x256xf32>
    %2 = vector.shape_cast %1 : vector<1x180x256xf32> to vector<180x256xf32>
    %cst = arith.constant dense<0.000000e+00> : vector<20x256xf32>
    %3 = tpu.matmul %0, %2, %cst {dimension_numbers = #tpu.dot_dimension_numbers<[1], [0], [0], [1], [0, 0, 1, 1], [], []>} : vector<20x180xf32>, vector<180x256xf32>, vector<20x256xf32> -> vector<20x256xf32>
    %c0_4 = arith.constant 0 : index
    %c0_5 = arith.constant 0 : index
    %c0_6 = arith.constant 0 : index
    %4 = vector.load %arg4[%c0_4, %c0_5, %c0_6] : memref<1x20x256xf32, #tpu.memory_space<vmem>>, vector<1x20x256xf32>
    %5 = vector.shape_cast %4 : vector<1x20x256xf32> to vector<20x256xf32>
    %6 = vector.shape_cast %3 : vector<20x256xf32> to vector<1x20x256xf32>
    tpu.vector_store %arg4[%c0_4, %c0_5, %c0_6], %6 {strides = array<i32>} : memref<1x20x256xf32, #tpu.memory_space<vmem>>, vector<1x20x256xf32>,
    return
  }
  func.func @transform_0(%arg0: i32, %arg1: i32) -> (i32, i32) {
    %c0_i32 = arith.constant 0 : i32
    %c0_i32_0 = arith.constant 0 : i32
    %c0_i32_1 = arith.constant 0 : i32
    return %c0_i32, %c0_i32_0 : i32, i32
  }
  func.func @transform_1(%arg0: i32, %arg1: i32) -> (i32, i32, i32) {
    %c0_i32 = arith.constant 0 : i32
    %c0_i32_0 = arith.constant 0 : i32
    return %arg0, %c0_i32, %arg1 : i32, i32, i32
  }
  func.func @transform_2(%arg0: i32, %arg1: i32) -> (i32, i32, i32) {
    %c0_i32 = arith.constant 0 : i32
    %c0_i32_0 = arith.constant 0 : i32
    return %arg0, %c0_i32, %arg1 : i32, i32, i32
  }
}

</mosaic_0001>

<bundles_post_ra>
// kernel: forward.1
= control target key start
LH: loop header
LB: loop body
LE: loop exit
PB: predicated region body
PF: predicated region fallthrough
CT: control target
= control target key end

     0   :  { %s531_s9 = smov 0   ;;  %s533_s10 = smov 0   ;;  %s642_s0 = inlined_call_operand.vmem [shape: f32[20,180], index: 0, kind: input, shape index: {}]   ;;  %s643_s1 = inlined_call_operand.vmem [shape: f32[2,180,256], index: 1, kind: input, shape index: {}]   ;;  %s644_s2 = inlined_call_operand.vmem [shape: f32[2,20,256], index: 2, kind: output, shape index: {}]  }
   0x1   :  { %s535_s11 = smov 0  }
   0x2 LB: > { %s24_s12 = sadd.s32 1, %s510_s10  ;;  %p453_p0 = scmp.ge.s32.totalorder %s514_s11, 1  ;;  %s514_s11 = sphi %s535_s11, %s12_s11   ;;  %s510_s10 = sphi %s533_s10, %s646_s10   ;;  %s506_s9 = sphi %s531_s9, %s645_s9  }
   0x3   : > { %p26_p1 = scmp.ge.s32.totalorder %s24_s12, 2  ;;  %p133_p2 = scmp.lt.s32.totalorder %s514_s11, 3 }
   0x5   : > { %s648_s12 = smov (%p26_p1, %s24_s12), 0  ;;  %p134_p3 = pnand %p453_p0, %p133_p2 }
   0x6   : > { %p164_p4 = scmp.lt.s32.totalorder (!%p134_p3), %s506_s9, 1 }
   0x7   : > { %137 = sbr.rel (%p134_p3) target bundleno = 199 (0xc7), region = 28 }
   0xc   : > { %s650_s9 = smov (!%p164_p4, %s506_s9), 1  ;;  %vm245_vm0 = vcmask 1043456   ;;  %v184_v31 = vld [vmem:[%s642_s0 + $0x8] sm:$0xff]  ;;  %vm235_vm1 = vcmask 424960   ;;  %v186_v42 = vld [vmem:[%s642_s0 + $0x18] sm:$0xff]  ;;  %v183_v47 = vld [vmem:[%s642_s0] sm:$0xff] }
   0xd   : > { %s466_s13 = smul.u32 368, %s650_s9  ;;  %v188_v49 = vld [vmem:[%s642_s0 + $0x28] sm:$0xf]  ;;  %v185_v50 = vld [vmem:[%s642_s0 + $0x10] sm:$0xff]  ;;  %v187_v51 = vld [vmem:[%s642_s0 + $0x20] sm:$0xf] }
   0xe   : > { %s467_s29 = smul.u32 48, %s650_s9 }
   0xf   : > { %s555_s16 = scalar_lea.vmem %s643_s1, %s466_s13 }
  0x10   : > { %v220_v0 = vld [vmem:[%s555_s16 + $0xf8] sm:$0xff]  ;;  %v218_v1 = vld [vmem:[%s555_s16 + $0xe8] sm:$0xff]  ;;  %v219_v2 = vld [vmem:[%s555_s16 + $0xf0] sm:$0xff]  ;;  %s181_s4 = scalar_lea.vmem %s644_s2, %s467_s29 }
  0x11   : > { %304 = vmatpush.msra.mxu2 %v220_v0  ;;  %v217_v3 = vld [vmem:[%s555_s16 + $0xe0] sm:$0xff]  ;;  %v216_v4 = vld [vmem:[%s555_s16 + $0xd8] sm:$0xff]  ;;  %252 = vmatpush.msra.mxu0 %v219_v2  ;;  %v215_v5 = vld [vmem:[%s555_s16 + $0xd0] sm:$0xff] }
  0x12   : > { %v214_v6 = vld [vmem:[%s555_s16 + $0xc8] sm:$0xff]  ;;  %v213_v7 = vld [vmem:[%s555_s16 + $0xc0] sm:$0xff]  ;;  %v212_v9 = vld [vmem:[%s555_s16 + $0xb8] sm:$0xff] }
  0x13   : > { %305 = vmatpush.msra.mxu2 %v218_v1  ;;  %253 = vmatpush.msra.mxu0 %v217_v3  ;;  %v234_v8 = vld [vmem:[%s555_s16 + $0x168] sm:$0xf]  ;;  %v232_v10 = vld [vmem:[%s555_s16 + $0x158] sm:$0xff]  ;;  %v211_v11 = vld [vmem:[%s555_s16 + $0xb0] sm:$0xff] }
  0x14   : > { %460 = vmatpush.msk.msra.mxu3 %vm245_vm0, %v234_v8  ;;  %v230_v12 = vld [vmem:[%s555_s16 + $0x148] sm:$0xff]  ;;  %v233_v14 = vld [vmem:[%s555_s16 + $0x160] sm:$0xf]  ;;  %v228_v16 = vld [vmem:[%s555_s16 + $0x138] sm:$0xff] }
  0x15   : > { %306 = vmatpush.msra.mxu2 %v216_v4  ;;  %254 = vmatpush.msra.mxu0 %v215_v5  ;;  %v210_v13 = vld [vmem:[%s555_s16 + $0xa8] sm:$0xff]  ;;  %v209_v15 = vld [vmem:[%s555_s16 + $0xa0] sm:$0xff]  ;;  %v231_v17 = vld [vmem:[%s555_s16 + $0x150] sm:$0xff] }
  0x16   : > { %340 = vmatpush.msra.mxu3 %v232_v10  ;;  %456 = vmatpush.msk.msra.mxu1 %vm245_vm0, %v233_v14  ;;  %v208_v18 = vld [vmem:[%s555_s16 + $0x98] sm:$0xff]  ;;  %v207_v19 = vld [vmem:[%s555_s16 + $0x90] sm:$0xff]  ;;  %v226_v20 = vld [vmem:[%s555_s16 + $0x128] sm:$0xff] }
  0x17   : > { %307 = vmatpush.msra.mxu2 %v214_v6  ;;  %255 = vmatpush.msra.mxu0 %v213_v7  ;;  %v229_v21 = vld [vmem:[%s555_s16 + $0x140] sm:$0xff]  ;;  %v206_v22 = vld [vmem:[%s555_s16 + $0x88] sm:$0xff]  ;;  %v227_v23 = vld [vmem:[%s555_s16 + $0x130] sm:$0xff] }
  0x18   : > { %341 = vmatpush.msra.mxu3 %v230_v12  ;;  %288 = vmatpush.msra.mxu1 %v231_v17  ;;  %v205_v24 = vld [vmem:[%s555_s16 + $0x80] sm:$0xff]  ;;  %v224_v25 = vld [vmem:[%s555_s16 + $0x118] sm:$0xff]  ;;  %v203_v28 = vld [vmem:[%s555_s16 + $0x70] sm:$0xff] }
  0x19   : > { %308 = vmatpush.msra.mxu2 %v212_v9  ;;  %256 = vmatpush.msra.mxu0 %v211_v11  ;;  %v204_v26 = vld [vmem:[%s555_s16 + $0x78] sm:$0xff]  ;;  %v225_v27 = vld [vmem:[%s555_s16 + $0x120] sm:$0xff]  ;;  %v222_v29 = vld [vmem:[%s555_s16 + $0x108] sm:$0xff] }
  0x1a   : > { %342 = vmatpush.msra.mxu3 %v228_v16  ;;  %289 = vmatpush.msra.mxu1 %v229_v21  ;;  %v202_v30 = vld [vmem:[%s555_s16 + $0x68] sm:$0xff]  ;;  %v201_v32 = vld [vmem:[%s555_s16 + $0x60] sm:$0xff]  ;;  %v223_v33 = vld [vmem:[%s555_s16 + $0x110] sm:$0xff] }
  0x1b   : > { %309 = vmatpush.msra.mxu2 %v210_v13  ;;  %257 = vmatpush.msra.mxu0 %v209_v15  ;;  %v200_v34 = vld [vmem:[%s555_s16 + $0x58] sm:$0xff]  ;;  %v199_v35 = vld [vmem:[%s555_s16 + $0x50] sm:$0xff]  ;;  %v221_v36 = vld [vmem:[%s555_s16 + $0x100] sm:$0xff] }
  0x1c   : > { %343 = vmatpush.msra.mxu3 %v226_v20  ;;  %290 = vmatpush.msra.mxu1 %v227_v23  ;;  %v198_v37 = vld [vmem:[%s555_s16 + $0x48] sm:$0xff]  ;;  %v197_v38 = vld [vmem:[%s555_s16 + $0x40] sm:$0xff]  ;;  %v196_v39 = vld [vmem:[%s555_s16 + $0x38] sm:$0xff] }
  0x1d   : > { %310 = vmatpush.msra.mxu2 %v208_v18  ;;  %258 = vmatpush.msra.mxu0 %v207_v19  ;;  %v195_v40 = vld [vmem:[%s555_s16 + $0x30] sm:$0xff]  ;;  %v194_v41 = vld [vmem:[%s555_s16 + $0x28] sm:$0xff]  ;;  %v193_v43 = vld [vmem:[%s555_s16 + $0x20] sm:$0xff] }
  0x1e   : > { %344 = vmatpush.msra.mxu3 %v224_v25  ;;  %291 = vmatpush.msra.mxu1 %v225_v27  ;;  %v192_v44 = vld [vmem:[%s555_s16 + $0x18] sm:$0xff]  ;;  %v191_v45 = vld [vmem:[%s555_s16 + $0x10] sm:$0xff]  ;;  %v190_v46 = vld [vmem:[%s555_s16 + $0x8] sm:$0xff] }
  0x1f   : > { %311 = vmatpush.msra.mxu2 %v206_v22  ;;  %259 = vmatpush.msra.mxu0 %v205_v24  ;;  %v189_v48 = vld [vmem:[%s555_s16] sm:$0xff] }
  0x20   : > { %345 = vmatpush.msra.mxu3 %v222_v29  ;;  %292 = vmatpush.msra.mxu1 %v223_v33 }
  0x21   : > { %312 = vmatpush.msra.mxu2 %v204_v26  ;;  %260 = vmatpush.msra.mxu0 %v203_v28 }
  0x22   : > { %461 = vmatmul.msk.f32.vlgmr.msra.gmra.mxu3 %vm235_vm1, %v184_v31  ;;  %293 = vmatpush.msra.mxu1 %v221_v36 }
  0x23   : > { %313 = vmatpush.msra.mxu2 %v202_v30  ;;  %261 = vmatpush.msra.mxu0 %v201_v32 }
  0x24   : > { %457 = vmatmul.msk.f32.vlgmr.msra.gmra.mxu1 %vm235_vm1, %v184_v31 }
  0x25   : > { %314 = vmatpush.msra.mxu2 %v200_v34  ;;  %262 = vmatpush.msra.mxu0 %v199_v35 }
  0x27   : > { %315 = vmatpush.msra.mxu2 %v198_v37  ;;  %263 = vmatpush.msra.mxu0 %v197_v38 }
  0x29   : > { %316 = vmatpush.msra.mxu2 %v196_v39  ;;  %264 = vmatpush.msra.mxu0 %v195_v40 }
  0x2a   : > { %462 = vmatmul.msk.f32.gmra.mxu3 %vm235_vm1, %v186_v42 }
  0x2b   : > { %317 = vmatpush.msra.mxu2 %v194_v41  ;;  %265 = vmatpush.msra.mxu0 %v193_v43 }
  0x2c   : > { %458 = vmatmul.msk.f32.gmra.mxu1 %vm235_vm1, %v186_v42 }
  0x2d   : > { %318 = vmatpush.msra.mxu2 %v192_v44  ;;  %266 = vmatpush.msra.mxu0 %v191_v45 }
  0x2f   : > { %319 = vmatpush.msra.mxu2 %v190_v46  ;;  %267 = vmatpush.msra.mxu0 %v189_v48 }
  0x30   : > { %320 = vmatmul.f32.vlgmr.msra.gmra.mxu2 %v183_v47  ;;  %268 = vmatmul.f32.vlgmr.msra.gmra.mxu0 %v183_v47 }
  0x32   : > { %463 = vmatmul.msk.f32.gmra.mxu3 %vm235_vm1, %v188_v49 }
  0x34   : > { %459 = vmatmul.msk.f32.gmra.mxu1 %vm235_vm1, %v188_v49 }
  0x38   : > { %323 = vmatmul.f32.gmra.mxu2 %v185_v50  ;;  %271 = vmatmul.f32.gmra.mxu0 %v185_v50 }
  0x40   : > { %326 = vmatmul.f32.gmra.mxu2 %v187_v51  ;;  %274 = vmatmul.f32.gmra.mxu0 %v187_v51 }
  0xa1   : > { %v295_v52 = vpop.f32.mrf.mxu1 }
  0xa5   : > { %v347_v53 = vpop.f32.mrf.mxu3 }
  0xa9   : > { %v298_v56 = vpop.f32.mrf.mxu1 }
  0xad   : > { %v269_v54 = vpop.f32.mrf.mxu0  ;;  %v350_v61 = vpop.f32.mrf.mxu3 }
  0xae   : > { %v296_v55 = vadd.f32 %v295_v52, %v269_v54 }
  0xb0   : > { %356 = vst [vmem:[%s181_s4] sm:$0xff] %v296_v55 }
  0xb1   : > { %v301_v0 = vpop.f32.mrf.mxu1 }
  0xb3   : > { %v321_v57 = vpop.f32.mrf.mxu2 }
  0xb4   : > { %v348_v58 = vadd.f32 %v347_v53, %v321_v57 }
  0xb5   : > { %v272_v59 = vpop.f32.mrf.mxu0  ;;  %v353_v3 = vpop.f32.mrf.mxu3 }
  0xb6   : > { %357 = vst [vmem:[%s181_s4 + $0x8] sm:$0xff] %v348_v58  ;;  %v299_v60 = vadd.f32 %v298_v56, %v272_v59 }
  0xb8   : > { %358 = vst [vmem:[%s181_s4 + $0x10] sm:$0xff] %v299_v60 }
  0xbb   : > { %v324_v62 = vpop.f32.mrf.mxu2 }
  0xbc   : > { %v351_v63 = vadd.f32 %v350_v61, %v324_v62 }
  0xbd   : > { %v275_v1 = vpop.f32.mrf.mxu0 }
  0xbe   : > { %359 = vst [vmem:[%s181_s4 + $0x18] sm:$0xff] %v351_v63  ;;  %v302_v2 = vadd.f32 %v301_v0, %v275_v1 }
  0xc0   : > { %360 = vst [vmem:[%s181_s4 + $0x20] sm:$0xf] %v302_v2 }
  0xc3   : > { %v327_v4 = vpop.f32.mrf.mxu2 }
  0xc4   : > { %v354_v5 = vadd.f32 %v353_v3, %v327_v4 }
  0xc6   : > { %361 = vst [vmem:[%s181_s4 + $0x28] sm:$0xf] %v354_v5 }
  0xc7 PF: > { %s12_s11 = sadd.s32 1, %s514_s11   ;;  %s645_s9 = smov %s510_s10 }
  0xc8   : > { %p9_p5 = scmp.ge.s32.totalorder %s12_s11, 4   ;;  %s646_s10 = smov %s648_s12 }
  0xca   :  { %11 = sbr.rel (!%p9_p5) target bundleno = 2 (0x2), region = 58 }

</bundles_post_ra>
